<compile_context>
chip_gen: v5e
topology: v5e:2x2
jax: 0.10.0
libtpu: 0.0.40
codegen_flags: <defaults>
</compile_context>

<pallas_src>
import jax
import jax.numpy as jnp
from jax.experimental import pallas as pl
from jax.experimental.pallas import tpu as pltpu

IMG_FEATURE_DIM = 128
RESNET_LOGITS = 1000               # backbone logit width (un-padded, = 125*8)
HEAD_SIZES = (9, 16, 25, 36, 2)    # GazeZone9/16/25/36, gazeEs
HEADS_TOTAL = sum(HEAD_SIZES)      # 88
HEADS_PAD = 128                    # lane-dense padded heads width
MAX_BATCH_TILE = 1024              # batch tile cap (v6e amortization, v7x-safe)


def _round_up(n, m):
    return ((n + m - 1) // m) * m


def _gaze_kernel(x_ref, wfc_ref, bfc_ref, wh_ref, bh_ref, feat_ref, heads_ref):
    # x arrives as raw f32 backbone logits; cast to bf16 in VMEM (free VPU
    # filler on a mem-bound kernel, avoids an extra HBM pass).
    x = x_ref[...].astype(jnp.bfloat16)
    # fc2: (TB, 1000) bf16 @ (1000, 128) bf16 -> f32 accumulate, f32 bias add
    feat = jnp.dot(x, wfc_ref[...],
                   preferred_element_type=jnp.float32) + bfc_ref[...]
    # dropout in eval mode is identity
    feat_ref[...] = feat.astype(feat_ref.dtype)
    # all 5 heads fused: (TB, 128) bf16 @ (128, 128) bf16 -> f32 + f32 bias
    heads = jnp.dot(feat.astype(wh_ref.dtype), wh_ref[...],
                    preferred_element_type=jnp.float32) + bh_ref[...]
    heads_ref[...] = heads.astype(heads_ref.dtype)


def prepack_params(w_fc2, b_fc2, w_heads, b_heads):
    """One-time weight packing. Call OUTSIDE the per-call jitted path."""
    wfc = jnp.asarray(w_fc2, jnp.bfloat16)                         # (1000, 128)
    bfc = jnp.asarray(b_fc2, jnp.float32).reshape(1, IMG_FEATURE_DIM)
    wh = jnp.zeros((IMG_FEATURE_DIM, HEADS_PAD), jnp.bfloat16)
    wh = wh.at[:, :HEADS_TOTAL].set(jnp.asarray(w_heads, jnp.bfloat16))
    bh = jnp.zeros((1, HEADS_PAD), jnp.float32)
    bh = bh.at[:, :HEADS_TOTAL].set(jnp.asarray(b_heads, jnp.float32))
    return wfc, bfc, wh, bh


def gaze_forward(x, wfc, bfc, wh, bh, *, out_dtype=jnp.float32,
                 core_parallel=False):
    """x: (B, 1000) f32 backbone logits; wfc/bfc/wh/bh from prepack_params.

    Returns (gazefeature, gaze, [gz9, gz16, gz25, gz36]), matching the
    PyTorch forward (dropout in eval mode is identity).
    """
    B = x.shape[0]
    # Balanced batch tiling: padding bounded by 7 rows regardless of B.
    n_tiles = pl.cdiv(B, MAX_BATCH_TILE)
    TB = _round_up(pl.cdiv(B, n_tiles), 8)
    B_pad = n_tiles * TB
    if B_pad != B:
        x = jnp.pad(x, ((0, B_pad - B), (0, 0)))

    flops = 2 * B_pad * (RESNET_LOGITS * IMG_FEATURE_DIM
                         + IMG_FEATURE_DIM * HEADS_PAD)
    out_bytes = jnp.dtype(out_dtype).itemsize
    bytes_accessed = (B_pad * RESNET_LOGITS * 4            # x read (f32)
                      + wfc.size * 2 + wh.size * 2         # bf16 weights
                      + bfc.size * 4 + bh.size * 4         # f32 biases
                      + B_pad * IMG_FEATURE_DIM * out_bytes
                      + B_pad * HEADS_PAD * out_bytes)

    # TODO(synk): on v7x, pass core_parallel=True (and >=2 grid tiles) to
    # engage the second TensorCore; kept off by default for 1-TC v5e/v6e.
    dim_sem = (pltpu.CORE_PARALLEL,) if core_parallel else ("parallel",)

    feat_p, heads_p = pl.pallas_call(
        _gaze_kernel,
        out_shape=(
            jax.ShapeDtypeStruct((B_pad, IMG_FEATURE_DIM), out_dtype),
            jax.ShapeDtypeStruct((B_pad, HEADS_PAD), out_dtype),
        ),
        grid=(n_tiles,),
        in_specs=[
            # x tile: full 1000-wide rows (equals full last dim -> legal block)
            pl.BlockSpec((TB, RESNET_LOGITS), lambda i: (i, 0)),
            # weights / biases: constant-index -> VMEM-resident across tiles
            pl.BlockSpec((RESNET_LOGITS, IMG_FEATURE_DIM), lambda i: (0, 0)),
            pl.BlockSpec((1, IMG_FEATURE_DIM), lambda i: (0, 0)),
            pl.BlockSpec((IMG_FEATURE_DIM, HEADS_PAD), lambda i: (0, 0)),
            pl.BlockSpec((1, HEADS_PAD), lambda i: (0, 0)),
        ],
        out_specs=(
            pl.BlockSpec((TB, IMG_FEATURE_DIM), lambda i: (i, 0)),
            pl.BlockSpec((TB, HEADS_PAD), lambda i: (i, 0)),
        ),
        compiler_params=pltpu.CompilerParams(dimension_semantics=dim_sem),
        cost_estimate=pl.CostEstimate(
            flops=flops, transcendentals=0, bytes_accessed=bytes_accessed),
    )(x, wfc, bfc, wh, bh)

    feat = feat_p[:B]
    heads = heads_p[:B, :HEADS_TOTAL]   # drop the lane padding

    # split concatenated head outputs back into the 5 PyTorch outputs
    outs = []
    off = 0
    for sz in HEAD_SIZES:
        outs.append(heads[:, off:off + sz])
        off += sz
    gz9, gz16, gz25, gz36, gaze = outs
    return feat, gaze, [gz9, gz16, gz25, gz36]


def init_params(key):
    k1, k2, k3, k4 = jax.random.split(key, 4)
    # fc2: Linear(1000, 128). Stored as (in, out) so kernel does x @ W.
    w_fc2 = jax.random.normal(k1, (RESNET_LOGITS, IMG_FEATURE_DIM),
                              jnp.float32) * 0.02
    b_fc2 = jax.random.normal(k2, (1, IMG_FEATURE_DIM), jnp.float32) * 0.01
    # heads concatenated along output dim: (128, 9+16+25+36+2 = 88)
    w_heads = jax.random.normal(k3, (IMG_FEATURE_DIM, HEADS_TOTAL),
                                jnp.float32) * 0.05
    b_heads = jax.random.normal(k4, (1, HEADS_TOTAL), jnp.float32) * 0.01
    return w_fc2, b_fc2, w_heads, b_heads


if __name__ == "__main__":
    key = jax.random.PRNGKey(0)
    kx, kp = jax.random.split(key)

    B = 2
    # x stands for the resnet50 backbone's 1000-d logits for each face image
    x = jax.random.normal(kx, (B, RESNET_LOGITS), jnp.float32)
    params = init_params(kp)

    # One-time weight packing (outside the jitted per-call path).
    packed = prepack_params(*params)
    packed = jax.block_until_ready(packed)

    fwd = jax.jit(gaze_forward)
    feat, gaze, gazezone = fwd(x, *packed)
    jax.block_until_ready((feat, gaze, gazezone))

    assert feat.shape == (B, IMG_FEATURE_DIM)
    assert gaze.shape == (B, 2)
    assert [g.shape for g in gazezone] == [(B, 9), (B, 16), (B, 25), (B, 36)]

    # reference check in plain JAX (f32); kernel matmul inputs are bf16 with
    # f32 accumulation, so use a loosened tolerance.
    w_fc2, b_fc2, w_heads, b_heads = params
    ref_feat = x @ w_fc2 + b_fc2
    ref_heads = ref_feat @ w_heads + b_heads
    got_heads = jnp.concatenate(gazezone + [gaze], axis=1)
    assert jnp.allclose(feat, ref_feat, atol=5e-2), "feat mismatch"
    assert jnp.allclose(got_heads, ref_heads, atol=5e-2), "heads mismatch"

    print("KERNEL_OK")
</pallas_src>

<mosaic_0001>
module attributes {stable_mosaic.version = 11 : i64} {
  func.func @_gaze_kernel(%arg0: i32, %arg1: memref<8x1000xf32, #tpu.memory_space<vmem>>, %arg2: memref<1000x128xbf16, #tpu.memory_space<vmem>>, %arg3: memref<1x128xf32, #tpu.memory_space<vmem>>, %arg4: memref<128x128xbf16, #tpu.memory_space<vmem>>, %arg5: memref<1x128xf32, #tpu.memory_space<vmem>>, %arg6: memref<8x128xf32, #tpu.memory_space<vmem>>, %arg7: memref<8x128xf32, #tpu.memory_space<vmem>>) attributes {dimension_semantics = [#tpu.dimension_semantics<parallel>], iteration_bounds = array<i64: 1>, scalar_prefetch = 0 : i64, scratch_operands = 0 : i64, tpu.core_type = #tpu.core_type<tc>, window_params = [{transform_indices = @transform_0, window_bounds = array<i64: 8, 1000>}, {pipeline_mode = #tpu.pipeline_mode<synchronous>, transform_indices = @transform_1, window_bounds = array<i64: 1000, 128>}, {pipeline_mode = #tpu.pipeline_mode<synchronous>, transform_indices = @transform_2, window_bounds = array<i64: 1, 128>}, {pipeline_mode = #tpu.pipeline_mode<synchronous>, transform_indices = @transform_3, window_bounds = array<i64: 128, 128>}, {pipeline_mode = #tpu.pipeline_mode<synchronous>, transform_indices = @transform_4, window_bounds = array<i64: 1, 128>}, {transform_indices = @transform_5, window_bounds = array<i64: 8, 128>}, {transform_indices = @transform_6, window_bounds = array<i64: 8, 128>}]} {
    %c0 = arith.constant 0 : index
    %c0_0 = arith.constant 0 : index
    %0 = vector.load %arg1[%c0, %c0_0] : memref<8x1000xf32, #tpu.memory_space<vmem>>, vector<8x1000xf32>
    %1 = arith.truncf %0 : vector<8x1000xf32> to vector<8x1000xbf16>
    %c0_1 = arith.constant 0 : index
    %c0_2 = arith.constant 0 : index
    %2 = vector.load %arg2[%c0_1, %c0_2] : memref<1000x128xbf16, #tpu.memory_space<vmem>>, vector<1000x128xbf16>
    %cst = arith.constant dense<0.000000e+00> : vector<8x128xf32>
    %3 = tpu.matmul %1, %2, %cst {dimension_numbers = #tpu.dot_dimension_numbers<[1], [0], [0], [1], [0, 0, 1, 1], [], []>} : vector<8x1000xbf16>, vector<1000x128xbf16>, vector<8x128xf32> -> vector<8x128xf32>
    %c0_3 = arith.constant 0 : index
    %c0_4 = arith.constant 0 : index
    %4 = vector.load %arg3[%c0_3, %c0_4] : memref<1x128xf32, #tpu.memory_space<vmem>>, vector<1x128xf32>
    %5 = vector.broadcast %4 : vector<1x128xf32> to vector<8x128xf32>
    %6 = arith.addf %3, %5 : vector<8x128xf32>
    %c0_5 = arith.constant 0 : index
    %c0_6 = arith.constant 0 : index
    %7 = vector.load %arg6[%c0_5, %c0_6] : memref<8x128xf32, #tpu.memory_space<vmem>>, vector<8x128xf32>
    tpu.vector_store %arg6[%c0_5, %c0_6], %6 {strides = array<i32>} : memref<8x128xf32, #tpu.memory_space<vmem>>, vector<8x128xf32>,
    %8 = arith.truncf %6 : vector<8x128xf32> to vector<8x128xbf16>
    %c0_7 = arith.constant 0 : index
    %c0_8 = arith.constant 0 : index
    %9 = vector.load %arg4[%c0_7, %c0_8] : memref<128x128xbf16, #tpu.memory_space<vmem>>, vector<128x128xbf16>
    %cst_9 = arith.constant dense<0.000000e+00> : vector<8x128xf32>
    %10 = tpu.matmul %8, %9, %cst_9 {dimension_numbers = #tpu.dot_dimension_numbers<[1], [0], [0], [1], [0, 0, 1, 1], [], []>} : vector<8x128xbf16>, vector<128x128xbf16>, vector<8x128xf32> -> vector<8x128xf32>
    %c0_10 = arith.constant 0 : index
    %c0_11 = arith.constant 0 : index
    %11 = vector.load %arg5[%c0_10, %c0_11] : memref<1x128xf32, #tpu.memory_space<vmem>>, vector<1x128xf32>
    %12 = vector.broadcast %11 : vector<1x128xf32> to vector<8x128xf32>
    %13 = arith.addf %10, %12 : vector<8x128xf32>
    %c0_12 = arith.constant 0 : index
    %c0_13 = arith.constant 0 : index
    %14 = vector.load %arg7[%c0_12, %c0_13] : memref<8x128xf32, #tpu.memory_space<vmem>>, vector<8x128xf32>
    tpu.vector_store %arg7[%c0_12, %c0_13], %13 {strides = array<i32>} : memref<8x128xf32, #tpu.memory_space<vmem>>, vector<8x128xf32>,
    return
  }
  func.func @transform_0(%arg0: i32) -> (i32, i32) {
    %c0_i32 = arith.constant 0 : i32
    %c0_i32_0 = arith.constant 0 : i32
    return %arg0, %c0_i32 : i32, i32
  }
  func.func @transform_1(%arg0: i32) -> (i32, i32) {
    %c0_i32 = arith.constant 0 : i32
    %c0_i32_0 = arith.constant 0 : i32
    %c0_i32_1 = arith.constant 0 : i32
    return %c0_i32, %c0_i32_0 : i32, i32
  }
  func.func @transform_2(%arg0: i32) -> (i32, i32) {
    %c0_i32 = arith.constant 0 : i32
    %c0_i32_0 = arith.constant 0 : i32
    %c0_i32_1 = arith.constant 0 : i32
    return %c0_i32, %c0_i32_0 : i32, i32
  }
  func.func @transform_3(%arg0: i32) -> (i32, i32) {
    %c0_i32 = arith.constant 0 : i32
    %c0_i32_0 = arith.constant 0 : i32
    %c0_i32_1 = arith.constant 0 : i32
    return %c0_i32, %c0_i32_0 : i32, i32
  }
  func.func @transform_4(%arg0: i32) -> (i32, i32) {
    %c0_i32 = arith.constant 0 : i32
    %c0_i32_0 = arith.constant 0 : i32
    %c0_i32_1 = arith.constant 0 : i32
    return %c0_i32, %c0_i32_0 : i32, i32
  }
  func.func @transform_5(%arg0: i32) -> (i32, i32) {
    %c0_i32 = arith.constant 0 : i32
    %c0_i32_0 = arith.constant 0 : i32
    return %arg0, %c0_i32 : i32, i32
  }
  func.func @transform_6(%arg0: i32) -> (i32, i32) {
    %c0_i32 = arith.constant 0 : i32
    %c0_i32_0 = arith.constant 0 : i32
    return %arg0, %c0_i32 : i32, i32
  }
}

</mosaic_0001>

<bundles_post_ra>
// kernel: gaze_forward.1
= control target key start
LH: loop header
LB: loop body
LE: loop exit
PB: predicated region body
PF: predicated region fallthrough
CT: control target
= control target key end

     0   :  { %12 = vsyncpa [#allocation3], 0  ;;  %s1146_s24 = smov [#allocation2]   ;;  %s1147_s26 = smov 64   ;;  %s1247_s0 = inlined_call_operand.vmem [shape: f32[8,1000], index: 0, kind: input, shape index: {}]   ;;  %s1248_s1 = inlined_call_operand.hbm [shape: bf16[1000,128], index: 1, kind: input, shape index: {}]   ;;  %s1249_s2 = inlined_call_operand.vmem [shape: f32[1,128], index: 2, kind: input, shape index: {}]   ;;  %s1250_s3 = inlined_call_operand.vmem [shape: bf16[128,128], index: 3, kind: input, shape index: {}]   ;;  %s1251_s4 = inlined_call_operand.vmem [shape: f32[1,128], index: 4, kind: input, shape index: {}]   ;;  %s1252_s5 = inlined_call_operand.vmem [shape: f32[8,128], index: 5, kind: output, shape index: {0}]   ;;  %s1253_s6 = inlined_call_operand.vmem [shape: f32[8,128], index: 6, kind: output, shape index: {1}]  }
   0x1   :  { %s19_s23 = sshll.u32 %s1248_s1, 4  ;;  %s21_s25 = sshll.u32 %s1146_s24, 4  ;;  %s20_s23 = int_to_ptr.hbm [resolvable:$true] %s19_s23  ;;  %s22_s25 = int_to_ptr.vmem [resolvable:$true] %s21_s25 }
   0x2   :  { %s1148_s27 = smov 4  }
   0x3   :  { %27 = dma.hbm_to_vmem [thread:$0]  %s20_s23, 8000, %s22_s25, [#allocation3], %s1147_s26, %s1147_s26, %s1148_s27  }
   0x4   :  { %1144 = dma.done.wait [#allocation3], 8000  }
   0x5   :  { %1145 = vsyncadd [#allocation3], 4294959296  ;;  %v1052_v0 = vld [vmem:[#allocation2 + $0x38] sm:$0xff]  ;;  %v1051_v4 = vld [vmem:[#allocation2 + $0x30] sm:$0xff]  ;;  %vm563_vm0 = vcmask 1043456   ;;  %vm559_vm1 = vcmask 850944  }
   0x6   :  { %v1060_v1 = vld [vmem:[#allocation2 + $0x78] sm:$0xff]  ;;  %567 = vmatpush.bf16.msra.mxu0 %v1052_v0  ;;  %v1059_v5 = vld [vmem:[#allocation2 + $0x70] sm:$0xff]  ;;  %v1050_v8 = vld [vmem:[#allocation2 + $0x28] sm:$0xff] }
   0x7   :  { %v1068_v2 = vld [vmem:[#allocation2 + $0xb8] sm:$0xff]  ;;  %580 = vmatpush.bf16.msra.mxu1 %v1060_v1  ;;  %v1067_v6 = vld [vmem:[#allocation2 + $0xb0] sm:$0xff]  ;;  %v1058_v9 = vld [vmem:[#allocation2 + $0x68] sm:$0xff] }
   0x8   :  { %v1076_v3 = vld [vmem:[#allocation2 + $0xf8] sm:$0xff]  ;;  %593 = vmatpush.bf16.msra.mxu2 %v1068_v2  ;;  %v1075_v7 = vld [vmem:[#allocation2 + $0xf0] sm:$0xff]  ;;  %v1066_v10 = vld [vmem:[#allocation2 + $0xa8] sm:$0xff] }
   0x9   :  { %606 = vmatpush.bf16.msra.mxu3 %v1076_v3  ;;  %v1074_v11 = vld [vmem:[#allocation2 + $0xe8] sm:$0xff]  ;;  %v1049_v12 = vld [vmem:[#allocation2 + $0x20] sm:$0xff]  ;;  %v1048_v16 = vld [vmem:[#allocation2 + $0x18] sm:$0xff] }
   0xa   :  { %568 = vmatpush.bf16.msra.mxu0 %v1051_v4  ;;  %v1057_v13 = vld [vmem:[#allocation2 + $0x60] sm:$0xff]  ;;  %v1056_v17 = vld [vmem:[#allocation2 + $0x58] sm:$0xff]  ;;  %v1047_v20 = vld [vmem:[#allocation2 + $0x10] sm:$0xff] }
   0xb   :  { %581 = vmatpush.bf16.msra.mxu1 %v1059_v5  ;;  %v1065_v14 = vld [vmem:[#allocation2 + $0xa0] sm:$0xff]  ;;  %v1064_v18 = vld [vmem:[#allocation2 + $0x98] sm:$0xff]  ;;  %v1055_v21 = vld [vmem:[#allocation2 + $0x50] sm:$0xff] }
   0xc   :  { %594 = vmatpush.bf16.msra.mxu2 %v1067_v6  ;;  %v1073_v15 = vld [vmem:[#allocation2 + $0xe0] sm:$0xff]  ;;  %v1072_v19 = vld [vmem:[#allocation2 + $0xd8] sm:$0xff]  ;;  %v1063_v22 = vld [vmem:[#allocation2 + $0x90] sm:$0xff] }
   0xd   :  { %607 = vmatpush.bf16.msra.mxu3 %v1075_v7  ;;  %v1071_v23 = vld [vmem:[#allocation2 + $0xd0] sm:$0xff]  ;;  %v1046_v25 = vld [vmem:[#allocation2 + $0x8] sm:$0xff]  ;;  %v1045_v30 = vld [vmem:[#allocation2] sm:$0xff] }
   0xe   :  { %569 = vmatpush.bf16.msra.mxu0 %v1050_v8  ;;  %v179_v24 = vld [vmem:[#allocation2 + $0x1f0] sm:$0xf]  ;;  %v1054_v26 = vld [vmem:[#allocation2 + $0x48] sm:$0xff]  ;;  %v1053_v31 = vld [vmem:[#allocation2 + $0x40] sm:$0xff] }
   0xf   :  { %582 = vmatpush.bf16.msra.mxu1 %v1058_v9  ;;  %v433_v27 = vunpack.c.l.b16 %v179_v24  ;;  %v1062_v28 = vld [vmem:[#allocation2 + $0x88] sm:$0xff]  ;;  %v1061_v32 = vld [vmem:[#allocation2 + $0x80] sm:$0xff]  ;;  %v1084_v35 = vld [vmem:[#allocation2 + $0x138] sm:$0xff] }
  0x10   :  { %595 = vmatpush.bf16.msra.mxu2 %v1066_v10  ;;  %v1070_v29 = vld [vmem:[#allocation2 + $0xc8] sm:$0xff]  ;;  %v1069_v33 = vld [vmem:[#allocation2 + $0xc0] sm:$0xff]  ;;  %v41_v36 = vld [vmem:[%s1247_s0 + $0x10] sm:$0xff] }
  0x11   :  { %608 = vmatpush.bf16.msra.mxu3 %v1074_v11  ;;  %v496_v34 = vpack.c.b16 %v433_v27, %v433_v27  ;;  %v39_v37 = vld [vmem:[%s1247_s0] sm:$0xff]  ;;  %v1092_v38 = vld [vmem:[#allocation2 + $0x178] sm:$0xff]  ;;  %v40_v40 = vld [vmem:[%s1247_s0 + $0x8] sm:$0xff]  ;;  %v49_v43 = vpack.c.bf16 %v41_v36, %v41_v36 }
  0x12   :  { %570 = vmatpush.bf16.msra.mxu0 %v1049_v12  ;;  %v42_v39 = vld [vmem:[%s1247_s0 + $0x18] sm:$0xff]  ;;  %v47_v44 = vpack.c.bf16 %v39_v37, %v39_v37  ;;  %v48_v46 = vpack.c.bf16 %v40_v40, %v40_v40  ;;  %v1083_v47 = vld [vmem:[#allocation2 + $0x130] sm:$0xff]  ;;  %v1106_v50 = vld [vmem:[#allocation2 + $0x1e8] sm:$0xff] }
  0x13   :  { %583 = vmatpush.bf16.msra.mxu1 %v1057_v13  ;;  %v1100_v41 = vld [vmem:[#allocation2 + $0x1b8] sm:$0xff]  ;;  %v565_v42 = vsel %vm563_vm0, %v496_v34, 0  ;;  %v50_v45 = vpack.c.bf16 %v42_v39, %v42_v39  ;;  %v1091_v48 = vld [vmem:[#allocation2 + $0x170] sm:$0xff]  ;;  %v1082_v51 = vld [vmem:[#allocation2 + $0x128] sm:$0xff] }
  0x14   :  { %596 = vmatpush.bf16.msra.mxu2 %v1065_v14  ;;  %v1099_v49 = vld [vmem:[#allocation2 + $0x1b0] sm:$0xff]  ;;  %v1090_v52 = vld [vmem:[#allocation2 + $0x168] sm:$0xff]  ;;  %v1105_v54 = vld [vmem:[#allocation2 + $0x1e0] sm:$0xff] }
  0x15   :  { %609 = vmatpush.bf16.msra.mxu3 %v1073_v15  ;;  %v1098_v53 = vld [vmem:[#allocation2 + $0x1a8] sm:$0xff]  ;;  %v1081_v55 = vld [vmem:[#allocation2 + $0x120] sm:$0xff]  ;;  %v1104_v58 = vld [vmem:[#allocation2 + $0x1d8] sm:$0xff] }
  0x16   :  { %571 = vmatpush.bf16.msra.mxu0 %v1048_v16  ;;  %v1089_v56 = vld [vmem:[#allocation2 + $0x160] sm:$0xff]  ;;  %v1080_v59 = vld [vmem:[#allocation2 + $0x118] sm:$0xff]  ;;  %v1103_v62 = vld [vmem:[#allocation2 + $0x1d0] sm:$0xff] }
  0x17   :  { %584 = vmatpush.bf16.msra.mxu1 %v1056_v17  ;;  %v1097_v57 = vld [vmem:[#allocation2 + $0x1a0] sm:$0xff]  ;;  %v1088_v60 = vld [vmem:[#allocation2 + $0x158] sm:$0xff]  ;;  %v1079_v63 = vld [vmem:[#allocation2 + $0x110] sm:$0xff] }
  0x18   :  { %597 = vmatpush.bf16.msra.mxu2 %v1064_v18  ;;  %v1096_v61 = vld [vmem:[#allocation2 + $0x198] sm:$0xff]  ;;  %v1087_v0 = vld [vmem:[#allocation2 + $0x150] sm:$0xff]  ;;  %v1102_v2 = vld [vmem:[#allocation2 + $0x1c8] sm:$0xff] }
  0x19   :  { %610 = vmatpush.bf16.msra.mxu3 %v1072_v19  ;;  %v1095_v1 = vld [vmem:[#allocation2 + $0x190] sm:$0xff]  ;;  %v1078_v3 = vld [vmem:[#allocation2 + $0x108] sm:$0xff]  ;;  %v1101_v6 = vld [vmem:[#allocation2 + $0x1c0] sm:$0xff] }
  0x1a   :  { %572 = vmatpush.bf16.msra.mxu0 %v1047_v20  ;;  %v1086_v4 = vld [vmem:[#allocation2 + $0x148] sm:$0xff]  ;;  %v46_v7 = vld [vmem:[%s1247_s0 + $0x38] sm:$0xff]  ;;  %v1077_v9 = vld [vmem:[#allocation2 + $0x100] sm:$0xff] }
  0x1b   :  { %585 = vmatpush.bf16.msra.mxu1 %v1055_v21  ;;  %v1094_v5 = vld [vmem:[#allocation2 + $0x188] sm:$0xff]  ;;  %v54_v8 = vpack.c.bf16 %v46_v7, %v46_v7  ;;  %v1085_v10 = vld [vmem:[#allocation2 + $0x140] sm:$0xff]  ;;  %v45_v14 = vld [vmem:[%s1247_s0 + $0x30] sm:$0xff] }
  0x1c   :  { %598 = vmatpush.bf16.msra.mxu2 %v1063_v22  ;;  %v43_v11 = vld [vmem:[%s1247_s0 + $0x20] sm:$0xff]  ;;  %v44_v13 = vld [vmem:[%s1247_s0 + $0x28] sm:$0xff]  ;;  %v53_v17 = vpack.c.bf16 %v45_v14, %v45_v14  ;;  %v1114_v18 = vld [vmem:[%s1250_s3 + $0x38] sm:$0xff] }
  0x1d   :  { %611 = vmatpush.bf16.msra.mxu3 %v1071_v23  ;;  %v1093_v12 = vld [vmem:[#allocation2 + $0x180] sm:$0xff]  ;;  %v51_v15 = vpack.c.bf16 %v43_v11, %v43_v11  ;;  %v52_v16 = vpack.c.bf16 %v44_v13, %v44_v13  ;;  %v1113_v19 = vld [vmem:[%s1250_s3 + $0x30] sm:$0xff]  ;;  %v1112_v20 = vld [vmem:[%s1250_s3 + $0x28] sm:$0xff] }
  0x1e   :  { %573 = vmatpush.bf16.msra.mxu0 %v1046_v25  ;;  %v1111_v21 = vld [vmem:[%s1250_s3 + $0x20] sm:$0xff]  ;;  %v1110_v22 = vld [vmem:[%s1250_s3 + $0x18] sm:$0xff]  ;;  %v1109_v23 = vld [vmem:[%s1250_s3 + $0x10] sm:$0xff] }
  0x1f   :  { %586 = vmatpush.bf16.msra.mxu1 %v1054_v26  ;;  %v1108_v26 = vld [vmem:[%s1250_s3 + $0x8] sm:$0xff] }
  0x20   :  { %599 = vmatpush.bf16.msra.mxu2 %v1062_v28  ;;  %v1107_v28 = vld [vmem:[%s1250_s3] sm:$0xff] }
  0x21   :  { %612 = vmatpush.bf16.msra.mxu3 %v1070_v29 }
  0x22   :  { %574 = vmatpush.bf16.msra.mxu0 %v1045_v30 }
  0x23   :  { %587 = vmatpush.bf16.msra.mxu1 %v1053_v31 }
  0x24   :  { %600 = vmatpush.bf16.msra.mxu2 %v1061_v32  ;;  %v1118_v32 = vld [vmem:[%s1249_s2] ss:$0 sm:$0xff] }
  0x25   :  { %613 = vmatpush.bf16.msra.mxu3 %v1069_v33  ;;  %575 = vmatmul.bf16.vlgmr.msra.gmra.mxu0 %v47_v44 }
  0x26   :  { %619 = vmatpush.bf16.msrb.mxu0 %v1084_v35  ;;  %588 = vmatmul.bf16.vlgmr.msra.gmra.mxu1 %v48_v46 }
  0x27   :  { %632 = vmatpush.bf16.msrb.mxu1 %v1092_v38  ;;  %601 = vmatmul.bf16.vlgmr.msra.gmra.mxu2 %v49_v43 }
  0x28   :  { %645 = vmatpush.bf16.msrb.mxu2 %v1100_v41  ;;  %614 = vmatmul.bf16.vlgmr.msra.gmra.mxu3 %v50_v45 }
  0x29   :  { %659 = vmatpush.bf16.msrb.mxu3 %v565_v42 }
  0x2a   :  { %620 = vmatpush.bf16.msrb.mxu0 %v1083_v47 }
  0x2b   :  { %633 = vmatpush.bf16.msrb.mxu1 %v1091_v48 }
  0x2c   :  { %646 = vmatpush.bf16.msrb.mxu2 %v1099_v49 }
  0x2d   :  { %660 = vmatpush.bf16.msrb.mxu3 %v1106_v50 }
  0x2e   :  { %621 = vmatpush.bf16.msrb.mxu0 %v1082_v51 }
  0x2f   :  { %634 = vmatpush.bf16.msrb.mxu1 %v1090_v52  ;;  %v1119_v52 = vld [vmem:[%s1251_s4] ss:$0 sm:$0xff] }
  0x30   :  { %647 = vmatpush.bf16.msrb.mxu2 %v1098_v53 }
  0x31   :  { %661 = vmatpush.bf16.msrb.mxu3 %v1105_v54 }
  0x32   :  { %622 = vmatpush.bf16.msrb.mxu0 %v1081_v55 }
  0x33   :  { %635 = vmatpush.bf16.msrb.mxu1 %v1089_v56 }
  0x34   :  { %648 = vmatpush.bf16.msrb.mxu2 %v1097_v57 }
  0x35   :  { %662 = vmatpush.bf16.msrb.mxu3 %v1104_v58 }
  0x36   :  { %623 = vmatpush.bf16.msrb.mxu0 %v1080_v59 }
  0x37   :  { %636 = vmatpush.bf16.msrb.mxu1 %v1088_v60 }
  0x38   :  { %649 = vmatpush.bf16.msrb.mxu2 %v1096_v61 }
  0x39   :  { %663 = vmatpush.bf16.msrb.mxu3 %v1103_v62 }
  0x3a   :  { %624 = vmatpush.bf16.msrb.mxu0 %v1079_v63 }
  0x3b   :  { %637 = vmatpush.bf16.msrb.mxu1 %v1087_v0 }
  0x3c   :  { %650 = vmatpush.bf16.msrb.mxu2 %v1095_v1 }
  0x3d   :  { %664 = vmatpush.bf16.msrb.mxu3 %v1102_v2 }
  0x3e   :  { %625 = vmatpush.bf16.msrb.mxu0 %v1078_v3 }
  0x3f   :  { %638 = vmatpush.bf16.msrb.mxu1 %v1086_v4 }
  0x40   :  { %651 = vmatpush.bf16.msrb.mxu2 %v1094_v5 }
  0x41   :  { %665 = vmatpush.bf16.msrb.mxu3 %v1101_v6 }
  0x42   :  { %626 = vmatpush.bf16.msrb.mxu0 %v1077_v9 }
  0x43   :  { %639 = vmatpush.bf16.msrb.mxu1 %v1085_v10 }
  0x44   :  { %1012 = vmatmul.msk.bf16.vlgmr.msrb.gmra.mxu3 %vm559_vm1, %v54_v8  ;;  %652 = vmatpush.bf16.msrb.mxu2 %v1093_v12 }
  0x45   :  { %627 = vmatmul.bf16.vlgmr.msrb.gmra.mxu0 %v51_v15  ;;  %741 = vmatpush.bf16.msra.mxu3 %v1114_v18 }
  0x46   :  { %640 = vmatmul.bf16.vlgmr.msrb.gmra.mxu1 %v52_v16 }
  0x47   :  { %653 = vmatmul.bf16.vlgmr.msrb.gmra.mxu2 %v53_v17 }
  0x49   :  { %742 = vmatpush.bf16.msra.mxu3 %v1113_v19 }
  0x4d   :  { %743 = vmatpush.bf16.msra.mxu3 %v1112_v20 }
  0x51   :  { %744 = vmatpush.bf16.msra.mxu3 %v1111_v21 }
  0x55   :  { %745 = vmatpush.bf16.msra.mxu3 %v1110_v22 }
  0x59   :  { %746 = vmatpush.bf16.msra.mxu3 %v1109_v23 }
  0x5d   :  { %747 = vmatpush.bf16.msra.mxu3 %v1108_v26 }
  0x61   :  { %748 = vmatpush.bf16.msra.mxu3 %v1107_v28 }
  0xa2   :  { %v576_v24 = vpop.f32.mrf.mxu0 }
  0xa3   :  { %v589_v25 = vpop.f32.mrf.mxu1  ;;  %v577_v35 = vadd.f32 %v1118_v32, %v576_v24 }
  0xa5   :  { %v590_v36 = vadd.f32 %v589_v25, %v577_v35 }
  0xaa   :  { %v602_v27 = vpop.f32.mrf.mxu2  ;;  %v578_v30 = vpop.f32.mrf.mxu0 }
  0xab   :  { %v615_v29 = vpop.f32.mrf.mxu3  ;;  %v591_v31 = vpop.f32.mrf.mxu1  ;;  %v603_v37 = vadd.f32 %v602_v27, %v590_v36 }
  0xad   :  { %v616_v38 = vadd.f32 %v615_v29, %v603_v37 }
  0xb2   :  { %v604_v33 = vpop.f32.mrf.mxu2 }
  0xb3   :  { %v617_v34 = vpop.f32.mrf.mxu3 }
  0xc2   :  { %v628_v39 = vpop.f32.mrf.mxu0 }
  0xc3   :  { %v641_v40 = vpop.f32.mrf.mxu1  ;;  %v629_v41 = vadd.f32 %v628_v39, %v616_v38 }
  0xc5   :  { %v642_v43 = vadd.f32 %v641_v40, %v629_v41 }
  0xc7   :  { %v667_v42 = vpop.f32.mrf.mxu3 }
  0xca   :  { %v654_v44 = vpop.f32.mrf.mxu2  ;;  %v630_v46 = vpop.f32.mrf.mxu0 }
  0xcb   :  { %v655_v45 = vadd.f32 %v654_v44, %v642_v43  ;;  %v643_v47 = vpop.f32.mrf.mxu1 }
  0xcd   :  { %v668_v48 = vadd.f32 %v667_v42, %v655_v45 }
  0xcf   :  { %v669_v49 = vpop.f32.mrf.mxu3  ;;  %671 = vst [vmem:[%s1252_s5] sm:$0xff] %v668_v48  ;;  %v672_v50 = vpack.c.bf16 %v668_v48, %v668_v48 }
  0xd1   :  { %749 = vmatmul.bf16.vlgmr.msra.gmra.mxu3 %v672_v50 }
  0xd2   :  { %v656_v51 = vpop.f32.mrf.mxu2 }
 0x154   :  { %v750_v53 = vpop.f32.mrf.mxu3 }
 0x155   :  { %v751_v54 = vadd.f32 %v1119_v52, %v750_v53 }
 0x157   :  { %754 = vst [vmem:[%s1253_s6] sm:$0xff] %v751_v54 }
 0x15c   :  { %v752_v55 = vpop.f32.mrf.mxu3 }
 0x15d   :  { %763 = vsyncpa [#allocation3], 1 }

</bundles_post_ra>
